<compile_context>
chip_gen: v6e
topology: v6e:2x2x1
jax: 0.10.0
libtpu: 0.0.40
codegen_flags: <defaults>
</compile_context>

<pallas_src>
import jax
import jax.numpy as jnp
from jax.experimental import pallas as pl
from jax.experimental.pallas import tpu as pltpu

# ---- problem sizes (small, consistent with the module's "dimensions") ----
B, C, H, W = 2, 4, 16, 16          # batch, channels, spatial
D = C * H * W                      # img_size = prod(dimensions) = 1024
HID = 256                          # hidden width of the synthetic network
TIME_STEPS = 1000                  # noise-schedule horizon (for t scaling)

# ---- tiling ----
TN = 512                           # output-feature tile (D // TN grid steps)
TM = B if B < 256 else 256         # batch tile (== full B here)

assert D % TN == 0 and TN % 128 == 0
assert B % TM == 0


def x0_mlp_kernel(t_ref, x_ref, wt_ref, w1_ref, b1_ref, w2_ref, b2_ref, o_ref):
    """Fused: (x @ W1 + b1 + t*Wt) -> relu -> @ W2[:, tile] + b2[tile] -> tanh."""
    m = pl.program_id(0)                              # batch-tile index

    # ---- layer 1: bf16 MXU matmul, f32 accumulation -> (TM, HID) ----
    h = jnp.dot(x_ref[...], w1_ref[...],
                preferred_element_type=jnp.float32)

    # ---- time embedding from SMEM scalars (no VMEM (B,1) block) ----
    # Build the (TM, 1) column of t scalars with register-only selects, then a
    # single broadcasted outer product with wt, fused with b1 into one bias.
    row = jax.lax.broadcasted_iota(jnp.int32, (TM, 1), 0)
    tcol = jnp.zeros((TM, 1), jnp.float32)
    for b in range(TM):                               # TM static -> unrolled
        tcol = jnp.where(row == b, t_ref[m * TM + b], tcol)
    fused_bias = b1_ref[...] + tcol * wt_ref[...]     # (TM, HID) f32
    h = jnp.maximum(h + fused_bias, 0.0)              # relu (VPU, f32)

    # ---- layer 2 (this grid step's TN-slice of the output features) ----
    out = jnp.dot(h.astype(jnp.bfloat16), w2_ref[...],
                  preferred_element_type=jnp.float32)  # (TM, TN) f32
    o_ref[...] = jnp.tanh(out + b2_ref[...])           # x0Model's tanh (EUP)


def x0_model_forward(x, t, params):
    """x: (B, C, H, W) float32 NCHW;  t: (B,) int32 timesteps."""
    w1, b1, w2, b2, wt = params
    batch = x.shape[0]
    assert batch == B

    x_flat = x.reshape(batch, D).astype(jnp.bfloat16)               # bf16 MXU input
    t_scaled = t.astype(jnp.float32) / float(TIME_STEPS)            # (B,) SMEM scalars

    grid = (batch // TM, D // TN)
    n_tiles = D // TN
    flops = (batch // TM) * n_tiles * (2 * TM * D * HID + 2 * TM * HID * TN)
    bytes_accessed = (D * HID * 2 + HID * D * 2          # W1, W2 (bf16)
                      + batch * D * 2                    # x (bf16)
                      + (HID + D + HID) * 4 + batch * 4  # b1, b2, wt, t (f32)
                      + batch * D * 4)                   # output (f32)

    out_flat = pl.pallas_call(
        x0_mlp_kernel,
        out_shape=jax.ShapeDtypeStruct((batch, D), jnp.float32),
        grid=grid,
        in_specs=[
            pl.BlockSpec(memory_space=pltpu.MemorySpace.SMEM),   # t (B,) scalars
            pl.BlockSpec((TM, D),   lambda m, n: (m, 0)),        # x   (resident over n)
            pl.BlockSpec((1, HID),  lambda m, n: (0, 0)),        # wt  (resident)
            pl.BlockSpec((D, HID),  lambda m, n: (0, 0)),        # W1  (bf16, resident)
            pl.BlockSpec((1, HID),  lambda m, n: (0, 0)),        # b1  (resident)
            pl.BlockSpec((HID, TN), lambda m, n: (0, n)),        # W2 tile (bf16)
            pl.BlockSpec((1, TN),   lambda m, n: (0, n)),        # b2 tile
        ],
        out_specs=pl.BlockSpec((TM, TN), lambda m, n: (m, n)),   # lane-dense (TN=512)
        compiler_params=pltpu.CompilerParams(
            dimension_semantics=("parallel", "parallel")),        # v7x: 2 TCs split D
        cost_estimate=pl.CostEstimate(
            flops=flops,
            transcendentals=batch * D,
            bytes_accessed=bytes_accessed),
    )(t_scaled, x_flat, wt, w1, b1, w2, b2)

    # back to image layout (B, *dimensions), matching pred.view(batch, *dims)
    return out_flat.reshape(batch, C, H, W)


def init_params(key):
    """Deterministic synthetic weights (no checkpoint load). Weights in bf16."""
    k1, k2, k3 = jax.random.split(key, 3)
    w1 = (jax.random.normal(k1, (D, HID), jnp.float32)
          * (1.0 / jnp.sqrt(D))).astype(jnp.bfloat16)
    b1 = jnp.zeros((1, HID), jnp.float32)
    w2 = (jax.random.normal(k2, (HID, D), jnp.float32)
          * (1.0 / jnp.sqrt(HID))).astype(jnp.bfloat16)
    b2 = jnp.zeros((1, D), jnp.float32)
    wt = jax.random.normal(k3, (1, HID), jnp.float32) * 0.1
    return (w1, b1, w2, b2, wt)


if __name__ == "__main__":
    key = jax.random.PRNGKey(0)
    k_param, k_x, k_t = jax.random.split(key, 3)

    params = init_params(k_param)
    x = jax.random.normal(k_x, (B, C, H, W), jnp.float32)        # noisy image xt
    t = jax.random.randint(k_t, (B,), 0, TIME_STEPS, jnp.int32)  # sampled timesteps

    y = x0_model_forward(x, t, params)
    jax.block_until_ready(y)

    assert y.shape == (B, C, H, W)
    assert bool(jnp.all(jnp.abs(y) <= 1.0))  # tanh range sanity check
    print("KERNEL_OK")
</pallas_src>

<mosaic_0001>
module attributes {stable_mosaic.version = 11 : i64} {
  func.func @x0_mlp_kernel(%arg0: i32, %arg1: i32, %arg2: memref<2xf32, #tpu.memory_space<smem>>, %arg3: memref<2x1024xbf16, #tpu.memory_space<vmem>>, %arg4: memref<1x256xf32, #tpu.memory_space<vmem>>, %arg5: memref<1024x256xbf16, #tpu.memory_space<vmem>>, %arg6: memref<1x256xf32, #tpu.memory_space<vmem>>, %arg7: memref<256x512xbf16, #tpu.memory_space<vmem>>, %arg8: memref<1x512xf32, #tpu.memory_space<vmem>>, %arg9: memref<2x512xf32, #tpu.memory_space<vmem>>) attributes {dimension_semantics = [#tpu.dimension_semantics<parallel>, #tpu.dimension_semantics<parallel>], iteration_bounds = array<i64: 1, 2>, scalar_prefetch = 0 : i64, scratch_operands = 0 : i64, tpu.core_type = #tpu.core_type<tc>, window_params = [{transform_indices = @transform_0, window_bounds = array<i64: 2>}, {transform_indices = @transform_1, window_bounds = array<i64: 2, 1024>}, {pipeline_mode = #tpu.pipeline_mode<synchronous>, transform_indices = @transform_2, window_bounds = array<i64: 1, 256>}, {pipeline_mode = #tpu.pipeline_mode<synchronous>, transform_indices = @transform_3, window_bounds = array<i64: 1024, 256>}, {pipeline_mode = #tpu.pipeline_mode<synchronous>, transform_indices = @transform_4, window_bounds = array<i64: 1, 256>}, {transform_indices = @transform_5, window_bounds = array<i64: 256, 512>}, {transform_indices = @transform_6, window_bounds = array<i64: 1, 512>}, {transform_indices = @transform_7, window_bounds = array<i64: 2, 512>}]} {
    %c0 = arith.constant 0 : index
    %c0_0 = arith.constant 0 : index
    %0 = vector.load %arg3[%c0, %c0_0] : memref<2x1024xbf16, #tpu.memory_space<vmem>>, vector<2x1024xbf16>
    %c0_1 = arith.constant 0 : index
    %c0_2 = arith.constant 0 : index
    %1 = vector.load %arg5[%c0_1, %c0_2] : memref<1024x256xbf16, #tpu.memory_space<vmem>>, vector<1024x256xbf16>
    %cst = arith.constant dense<0.000000e+00> : vector<2x256xf32>
    %2 = tpu.matmul %0, %1, %cst {dimension_numbers = #tpu.dot_dimension_numbers<[1], [0], [0], [1], [0, 0, 1, 1], [], []>} : vector<2x1024xbf16>, vector<1024x256xbf16>, vector<2x256xf32> -> vector<2x256xf32>
    %3 = tpu.iota {dimensions = array<i32: 0>} : vector<2x1xi32>
    %cst_3 = arith.constant 0.000000e+00 : f32
    %4 = vector.broadcast %cst_3 : f32 to vector<2x1xf32>
    %c0_i32 = arith.constant 0 : i32
    %5 = vector.broadcast %c0_i32 : i32 to vector<2x1xi32>
    %6 = arith.cmpi eq, %3, %5 : vector<2x1xi32>
    %c2_i32 = arith.constant 2 : i32
    %7 = arith.muli %arg0, %c2_i32 : i32
    %c0_i32_4 = arith.constant 0 : i32
    %8 = arith.addi %7, %c0_i32_4 : i32
    %9 = arith.index_cast %8 : i32 to index
    %10 = memref.load %arg2[%9] : memref<2xf32, #tpu.memory_space<smem>>
    %11 = vector.broadcast %10 : f32 to vector<2x1xf32>
    %12 = arith.select %6, %11, %4 : vector<2x1xi1>, vector<2x1xf32>
    %c1_i32 = arith.constant 1 : i32
    %13 = vector.broadcast %c1_i32 : i32 to vector<2x1xi32>
    %14 = arith.cmpi eq, %3, %13 : vector<2x1xi32>
    %c2_i32_5 = arith.constant 2 : i32
    %15 = arith.muli %arg0, %c2_i32_5 : i32
    %c1_i32_6 = arith.constant 1 : i32
    %16 = arith.addi %15, %c1_i32_6 : i32
    %17 = arith.index_cast %16 : i32 to index
    %18 = memref.load %arg2[%17] : memref<2xf32, #tpu.memory_space<smem>>
    %19 = vector.broadcast %18 : f32 to vector<2x1xf32>
    %20 = arith.select %14, %19, %12 : vector<2x1xi1>, vector<2x1xf32>
    %c0_7 = arith.constant 0 : index
    %c0_8 = arith.constant 0 : index
    %21 = vector.load %arg6[%c0_7, %c0_8] : memref<1x256xf32, #tpu.memory_space<vmem>>, vector<1x256xf32>
    %c0_9 = arith.constant 0 : index
    %c0_10 = arith.constant 0 : index
    %22 = vector.load %arg4[%c0_9, %c0_10] : memref<1x256xf32, #tpu.memory_space<vmem>>, vector<1x256xf32>
    %23 = vector.broadcast %20 : vector<2x1xf32> to vector<2x256xf32>
    %24 = vector.broadcast %22 : vector<1x256xf32> to vector<2x256xf32>
    %25 = arith.mulf %23, %24 : vector<2x256xf32>
    %26 = vector.broadcast %21 : vector<1x256xf32> to vector<2x256xf32>
    %27 = arith.addf %26, %25 : vector<2x256xf32>
    %28 = arith.addf %2, %27 : vector<2x256xf32>
    %cst_11 = arith.constant 0.000000e+00 : f32
    %29 = vector.broadcast %cst_11 : f32 to vector<2x256xf32>
    %30 = arith.maximumf %28, %29 : vector<2x256xf32>
    %31 = arith.truncf %30 : vector<2x256xf32> to vector<2x256xbf16>
    %c0_12 = arith.constant 0 : index
    %c0_13 = arith.constant 0 : index
    %32 = vector.load %arg7[%c0_12, %c0_13] : memref<256x512xbf16, #tpu.memory_space<vmem>>, vector<256x512xbf16>
    %cst_14 = arith.constant dense<0.000000e+00> : vector<2x512xf32>
    %33 = tpu.matmul %31, %32, %cst_14 {dimension_numbers = #tpu.dot_dimension_numbers<[1], [0], [0], [1], [0, 0, 1, 1], [], []>} : vector<2x256xbf16>, vector<256x512xbf16>, vector<2x512xf32> -> vector<2x512xf32>
    %c0_15 = arith.constant 0 : index
    %c0_16 = arith.constant 0 : index
    %34 = vector.load %arg8[%c0_15, %c0_16] : memref<1x512xf32, #tpu.memory_space<vmem>>, vector<1x512xf32>
    %35 = vector.broadcast %34 : vector<1x512xf32> to vector<2x512xf32>
    %36 = arith.addf %33, %35 : vector<2x512xf32>
    %37 = math.tanh %36 : vector<2x512xf32>
    %c0_17 = arith.constant 0 : index
    %c0_18 = arith.constant 0 : index
    %38 = vector.load %arg9[%c0_17, %c0_18] : memref<2x512xf32, #tpu.memory_space<vmem>>, vector<2x512xf32>
    tpu.vector_store %arg9[%c0_17, %c0_18], %37 {strides = array<i32>} : memref<2x512xf32, #tpu.memory_space<vmem>>, vector<2x512xf32>,
    return
  }
  func.func @transform_0(%arg0: i32, %arg1: i32) -> i32 {
    %c0_i32 = arith.constant 0 : i32
    %c0_i32_0 = arith.constant 0 : i32
    return %c0_i32 : i32
  }
  func.func @transform_1(%arg0: i32, %arg1: i32) -> (i32, i32) {
    %c0_i32 = arith.constant 0 : i32
    %c0_i32_0 = arith.constant 0 : i32
    return %arg0, %c0_i32 : i32, i32
  }
  func.func @transform_2(%arg0: i32, %arg1: i32) -> (i32, i32) {
    %c0_i32 = arith.constant 0 : i32
    %c0_i32_0 = arith.constant 0 : i32
    %c0_i32_1 = arith.constant 0 : i32
    return %c0_i32, %c0_i32_0 : i32, i32
  }
  func.func @transform_3(%arg0: i32, %arg1: i32) -> (i32, i32) {
    %c0_i32 = arith.constant 0 : i32
    %c0_i32_0 = arith.constant 0 : i32
    %c0_i32_1 = arith.constant 0 : i32
    return %c0_i32, %c0_i32_0 : i32, i32
  }
  func.func @transform_4(%arg0: i32, %arg1: i32) -> (i32, i32) {
    %c0_i32 = arith.constant 0 : i32
    %c0_i32_0 = arith.constant 0 : i32
    %c0_i32_1 = arith.constant 0 : i32
    return %c0_i32, %c0_i32_0 : i32, i32
  }
  func.func @transform_5(%arg0: i32, %arg1: i32) -> (i32, i32) {
    %c0_i32 = arith.constant 0 : i32
    %c0_i32_0 = arith.constant 0 : i32
    return %c0_i32, %arg1 : i32, i32
  }
  func.func @transform_6(%arg0: i32, %arg1: i32) -> (i32, i32) {
    %c0_i32 = arith.constant 0 : i32
    %c0_i32_0 = arith.constant 0 : i32
    return %c0_i32, %arg1 : i32, i32
  }
  func.func @transform_7(%arg0: i32, %arg1: i32) -> (i32, i32) {
    %c0_i32 = arith.constant 0 : i32
    return %arg0, %arg1 : i32, i32
  }
}

</mosaic_0001>

<bundles_post_ra>
// kernel: tpu_custom_call.1
= control target key start
LH: loop header
LB: loop body
LE: loop exit
PB: predicated region body
PF: predicated region fallthrough
CT: control target
= control target key end

     0   :  { %s3268_s0 = inlined_call_operand.hbm [shape: f32[2], index: 0, kind: input, shape index: {}]   ;;  %s3269_s1 = inlined_call_operand.hbm [shape: bf16[2,1024], index: 1, kind: input, shape index: {}]   ;;  %s3270_s2 = inlined_call_operand.vmem [shape: f32[1,256], index: 2, kind: input, shape index: {}]   ;;  %s3271_s3 = inlined_call_operand.hbm [shape: bf16[1024,256], index: 3, kind: input, shape index: {}]   ;;  %s3272_s4 = inlined_call_operand.hbm [shape: f32[1,256], index: 4, kind: input, shape index: {}]   ;;  %s3273_s5 = inlined_call_operand.hbm [shape: bf16[256,1024], index: 5, kind: input, shape index: {}]   ;;  %s3274_s6 = inlined_call_operand.vmem [shape: f32[1,1024], index: 6, kind: input, shape index: {}]   ;;  %s3275_s7 = inlined_call_operand.hbm [shape: f32[2,1024], index: 7, kind: output, shape index: {}]  }
   0x1   :  { %3277 = sst [smem:[#allocation18_spill]] %s3268_s0 }
   0x2   :  { %3278 = sst [smem:[#allocation19_spill]] %s3269_s1 }
   0x3   :  { %3279 = sst [smem:[#allocation20_spill]] %s3271_s3 }
   0x4   :  { %12 = vsyncpa [#allocation5], 0 }
   0x5   :  { %13 = vsyncpa [#allocation3], 0 }
   0x6   :  { %14 = vsyncpa [#allocation8], 0 }
   0x7   :  { %15 = vsyncpa [#allocation11], 0 }
   0x8   :  { %17 = vsyncpa [#allocation11 + $0x1], 0 }
   0x9   :  { %18 = vsyncpa [#allocation4], 0 }
   0xa   :  { %20 = vsyncpa [#allocation4 + $0x1], 0  ;;  %s2984_s24 = smov 0   ;;  %s2986_s25 = smov 0  }
   0xb   :  { %s2988_s26 = smov 0   ;;  %s2990_s27 = smov 0  }
   0xc   :  { %s2992_s28 = smov 0   ;;  %s2994_s29 = smov 0  }
   0xd LB: > { %s2094_s30 = sadd.s32 4294967295, %s2929_s29   ;;  %s2095_s8 = sadd.s32 4294967294, %s2929_s29   ;;  %s2929_s29 = sphi %s2994_s29, %s26_s29   ;;  %s2925_s28 = sphi %s2992_s28, %s3298_s28   ;;  %s2921_s27 = sphi %s2990_s27, %s3297_s27   ;;  %s2917_s26 = sphi %s2988_s26, %s3296_s26   ;;  %s2913_s25 = sphi %s2986_s25, %s3295_s25   ;;  %s2909_s24 = sphi %s2984_s24, %s3294_s24  }
   0xe   : > { %p168_p0 = scmp.ne.s32.totalorder %s2913_s25, %s2909_s24  ;;  %p3018_p1 = scmp.eq.s32.totalorder %s2094_s30, 0 }
   0xf   : > { %p3022_p2 = scmp.eq.s32.totalorder %s2094_s30, 1  ;;  %p226_p3 = scmp.eq.s32.totalorder %s2095_s8, 1 }
  0x10   : > { %p3028_p4 = por %p3018_p1, %p168_p0  ;;  %p2096_p5 = scmp.ge.s32.totalorder %s2929_s29, 1 }
  0x11   : > { %p3033_p6 = por %p226_p3, %p168_p0  ;;  %p233_p7 = scmp.lt.s32.totalorder %s2929_s29, 3 }
  0x12   : > { %s3282_s11 = scalar_select %p3028_p4, 1, 0 }
  0x13   : > { %s3283_s12 = scalar_select %p3033_p6, 1, 0 }
  0x14   : > { %p3038_p8 = pnand %p2096_p5, %p233_p7  ;;  %s2931_s14 = smov [#allocation7]  }
  0x15   : > { %s271_s15 = sshll.u32 %s2931_s14, 4  ;;  %s2932_s17 = smov [#allocation6]   ;;  %s272_s15 = int_to_ptr.vmem [resolvable:$true] %s271_s15 }
  0x16   : > { %p2333_p9 = pneg %p3038_p8  ;;  %s258_s18 = sshll.u32 %s2932_s17, 4  ;;  %s259_s18 = int_to_ptr.vmem [resolvable:$true] %s258_s18 }
  0x17   : > { %s2731_s19 = scalar_lea.vmem %s272_s15, 16384  ;;  %p2739_p5 = scmp.lt.s32.totalorder %s272_s15, %s272_s15 }
  0x18   : > { %p3047_p11 = pnand %p2333_p9, %p3018_p1  ;;  %p2732_p13 = scmp.ne.s32.totalorder %s272_s15, %s2731_s19 }
  0x19   : > { %p2740_p7 = scmp.lt.s32.totalorder %s2731_s19, %s2731_s19 }
  0x1a   : > { %p2722_p12 = pneg %p3047_p11 }
  0x1b   : > { %p2741_p10 = por %p2740_p7, %p2739_p5 }
  0x1c   : > { %p2734_p0 = pnand %p2732_p13, %p2722_p12 }
  0x1e   : > { %p2735_p3 = pneg %p2734_p0 }
  0x20   : > { %p2742_p6 = pnand %p2741_p10, %p2735_p3 }
  0x22   : > { %2745 = shalt.err (!%p2742_p6)
}
  0x23   : > { %s2933_s20 = smov 128   ;;  %s2934_s21 = smov 8  }
  0x24   : > { %s3286_s3 = sld [smem:[#allocation20_spill]]  ;;  %s2935_s30 = smov [#allocation2]  }
  0x25   : > { %s3287_s0 = sld [smem:[#allocation18_spill]]  ;;  %s2768_s17 = scalar_lea.vmem %s259_s18, 128 }
  0x26   : > { %p2769_p9 = scmp.ne.s32.totalorder %s259_s18, %s2768_s17  ;;  %p2776_p13 = scmp.lt.s32.totalorder %s259_s18, %s259_s18 }
  0x27   : > { %p2777_p0 = scmp.lt.s32.totalorder %s2768_s17, %s2768_s17 }
  0x28   : > { %p2771_p6 = pnand %p2769_p9, %p2722_p12 }
  0x29   : > { %p2778_p3 = por %p2777_p0, %p2776_p13 }
  0x2a   : > { %2342 = dma.hbm_to_vmem [thread:$0]  (!%p3047_p11), %s3286_s3, 16384, %s272_s15, [#allocation8], %s2933_s20, %s2933_s20, %s2934_s21  }
  0x2b   : > { %2336 = dma.hbm_to_smem (!%p3047_p11), %s3287_s0, 16, %s2935_s30, [#allocation5]  }
  0x2c   : > { %p2772_p10 = pneg %p2771_p6 }
  0x2e   : > { %p2779_p5 = pnand %p2778_p3, %p2772_p10 }
  0x30   : > { %2782 = shalt.err (!%p2779_p5)
}
  0x31   : > { %s3288_s1 = sld [smem:[#allocation19_spill]]  ;;  %s2936_s20 = smov [#allocation9]  }
  0x32   : > { %s285_s21 = sshll.u32 %s2936_s20, 4  ;;  %s286_s21 = int_to_ptr.vmem [resolvable:$true] %s285_s21 }
  0x33   : > { %s2794_s22 = scalar_lea.vmem %s286_s21, 32  ;;  %p2802_p4 = scmp.lt.s32.totalorder %s286_s21, %s286_s21 }
  0x34   : > { %p2795_p7 = scmp.ne.s32.totalorder %s286_s21, %s2794_s22  ;;  %p2803_p13 = scmp.lt.s32.totalorder %s2794_s22, %s2794_s22 }
  0x36   : > { %p2797_p9 = pnand %p2795_p7, %p2722_p12  ;;  %p2804_p10 = por %p2803_p13, %p2802_p4 }
  0x37   : > { %2339 = dma.hbm_to_vmem [thread:$0]  (!%p3047_p11), %s3288_s1, 128, %s259_s18, [#allocation3]  }
  0x38   : > { %p2798_p6 = pneg %p2797_p9 }
  0x3a   : > { %p2805_p0 = pnand %p2804_p10, %p2798_p6 }
  0x3c   : > { %2808 = shalt.err (!%p2805_p0)
}
  0x3d   : > { %2345 = dma.hbm_to_vmem [thread:$0]  (!%p3047_p11), %s3272_s4, 32, %s286_s21, [#allocation8]  }
  0x3e   : > { %s35_s18 = sadd.s32 1, %s2925_s28  ;;  %s155_s8 = sadd.s32 1, %s2917_s26 }
  0x3f   : > { %p36_p4 = scmp.ge.s32.totalorder %s35_s18, 2  ;;  %p162_p12 = scmp.ne.s32.totalorder %s2917_s26, %s2913_s25 }
  0x40   : > { %p163_p3 = scmp.eq.s32.totalorder %s2929_s29, 0  ;;  %p2358_p5 = scmp.lt.s32.totalorder %s2929_s29, 2 }
  0x41   : > { %s3300_s18 = smov (%p36_p4, %s35_s18), 0  ;;  %p3092_p9 = por %p3022_p2, %p162_p12 }
  0x42   : > { %p164_p7 = por %p163_p3, %p162_p12  ;;  %s152_s14 = ssub.s32 %s2925_s28, %s3300_s18 }
  0x43   : > { %s296_s17 = sand.u32 1, %s2917_s26   ;;  %p153_p6 = scmp.eq.s32.totalorder %s152_s14, 0 }
  0x44   : > { %s2102_s15 = sshll.u32 %s296_s17, 9  ;;  %s2311_s19 = sshll.u32 %s2925_s28, 8 }
  0x45   : > { %s3101_s20 = scalar_select %p153_p6, %s2917_s26, %s155_s8  }
  0x46   : > { %s306_s23 = scalar_lea.hbm %s3273_s5, %s2311_s19  ;;  %s300_s30 = scalar_lea.vmem [#allocation10], %s2102_s15 }
  0x47   : > { %s307_s0 = sshll.u32 %s300_s30, 4  ;;  %p3108_p11 = pnand %p2358_p5, %p164_p7  ;;  %s308_s0 = int_to_ptr.vmem [resolvable:$true] %s307_s0 }
  0x48   : > { %s297_s1 = scalar_lea.sflag [#allocation11], %s296_s17  ;;  %s2822_s14 = scalar_lea.vmem %s308_s0, 8192 }
  0x49   : > { %p2811_p2 = pneg %p3108_p11  ;;  %p2823_p13 = scmp.ne.s32.totalorder %s308_s0, %s2822_s14 }
  0x4a   : > { %s2937_s8 = smov [#allocation10]  }
  0x4b   : > { %p2825_p10 = pnand %p2823_p13, %p2811_p2  ;;  %s2827_s3 = sshll.u32 %s2937_s8, 4  ;;  %s2828_s3 = int_to_ptr.vmem [resolvable:$false] %s2827_s3 }
  0x4c   : > { %s2829_s19 = scalar_lea.vmem %s2828_s3, 16384  ;;  %p2830_p4 = scmp.lt.s32.totalorder %s308_s0, %s2828_s3 }
  0x4d   : > { %p2826_p0 = pneg %p2825_p10  ;;  %p2831_p12 = scmp.lt.s32.totalorder %s2829_s19, %s2822_s14 }
  0x4f   : > { %p2832_p3 = por %p2831_p12, %p2830_p4 }
  0x51   : > { %p2833_p5 = pnand %p2832_p3, %p2826_p0 }
  0x53   : > { %2836 = shalt.err (!%p2833_p5)
}
  0x54   : > { %s2938_s15 = smov 512   ;;  %s2939_s21 = smov 256  }
  0x55   : > { %s2940_s22 = smov 16   ;;  %327 = sbr.rel (%p3038_p8) target bundleno = 665 (0x299), region = 48 }
  0x56   : > { %2349 = dma.hbm_to_vmem [thread:$0]  (!%p3108_p11), %s306_s23, 8192, %s308_s0, %s297_s1, %s2938_s15, %s2939_s21, %s2940_s22  }
  0x5a   : > { %2888 = dma.done.wait (%p3018_p1), [#allocation5], 16  }
  0x5b   : > { %2890 = vsyncadd (%p3018_p1), [#allocation5], 4294967280 }
  0x5c   : > { %2892 = dma.done.wait (%p3018_p1), [#allocation3], 128  }
  0x5d   : > { %2894 = vsyncadd (%p3018_p1), [#allocation3], 4294967168 }
  0x5e   : > { %2896 = dma.done.wait (%p3018_p1), [#allocation8], 16416  }
  0x5f   : > { %2898 = vsyncadd (%p3018_p1), [#allocation8], 4294950880  ;;  %s3131_s0 = sand.u32 1, %s2913_s25   ;;  %p3291_p8 = scmp.ne.s32.totalorder %s3282_s11, 0 }
  0x60   : > { %s2110_s1 = sshll.u32 %s3131_s0, 9  ;;  %s346_s3 = scalar_lea.sflag [#allocation11], %s3131_s0 }
  0x61   : > { %s3135_s13 = scalar_lea.vmem [#allocation10], %s2110_s1 }
  0x62   : > { %2900 = dma.done.wait (%p3291_p8), %s346_s3, 8192  }
  0x63   : > { %2902 = vsyncadd (%p3291_p8), %s346_s3, 4294959104 }
  0x64   : > { %354 = sfence }
  0x65   : > { %v2423_v0 = vld [vmem:[#allocation7 + $0x74] ss:$8 sps:$4 sm:$0xff]   ;;  %v2427_v2 = vld [vmem:[#allocation7 + $0x70] ss:$8 sps:$4 sm:$0xff]   ;;  %v2429_v4 = vld [vmem:[#allocation7 + $0x64] ss:$8 sps:$4 sm:$0xff]   ;;  %v521_v36 = vlaneseq }
  0x66   : > { %v2425_v1 = vld [vmem:[#allocation7 + $0x174] ss:$8 sps:$4 sm:$0xff]   ;;  %1259 = vmatprep.subr.bf16.mxu0 %v2423_v0  ;;  %v2428_v3 = vld [vmem:[#allocation7 + $0x170] ss:$8 sps:$4 sm:$0xff]   ;;  %v2431_v5 = vld [vmem:[#allocation7 + $0x164] ss:$8 sps:$4 sm:$0xff]  }
  0x67   : > { %1300 = vmatprep.subr.bf16.mxu1 %v2425_v1  ;;  %1260 = vmatpush1.bf16.msra.mxu0 %v2427_v2  ;;  %v2433_v6 = vld [vmem:[#allocation7 + $0x60] ss:$8 sps:$4 sm:$0xff]   ;;  %v2435_v8 = vld [vmem:[#allocation7 + $0x54] ss:$8 sps:$4 sm:$0xff]   ;;  %v2439_v10 = vld [vmem:[#allocation7 + $0x50] ss:$8 sps:$4 sm:$0xff]  }
  0x68   : > { %1301 = vmatpush1.bf16.msra.mxu1 %v2428_v3  ;;  %1261 = vmatprep.subr.bf16.mxu0 %v2429_v4  ;;  %v2434_v7 = vld [vmem:[#allocation7 + $0x160] ss:$8 sps:$4 sm:$0xff]   ;;  %v2437_v9 = vld [vmem:[#allocation7 + $0x154] ss:$8 sps:$4 sm:$0xff]   ;;  %v2440_v11 = vld [vmem:[#allocation7 + $0x150] ss:$8 sps:$4 sm:$0xff]  }
  0x69   : > { %1302 = vmatprep.subr.bf16.mxu1 %v2431_v5  ;;  %v2441_v12 = vld [vmem:[#allocation7 + $0x44] ss:$8 sps:$4 sm:$0xff]   ;;  %v2445_v14 = vld [vmem:[#allocation7 + $0x40] ss:$8 sps:$4 sm:$0xff]   ;;  %v2447_v16 = vld [vmem:[#allocation7 + $0x34] ss:$8 sps:$4 sm:$0xff]  }
  0x6a   : > { %v2443_v13 = vld [vmem:[#allocation7 + $0x144] ss:$8 sps:$4 sm:$0xff]   ;;  %v2446_v15 = vld [vmem:[#allocation7 + $0x140] ss:$8 sps:$4 sm:$0xff]   ;;  %v2449_v17 = vld [vmem:[#allocation7 + $0x134] ss:$8 sps:$4 sm:$0xff]  }
  0x6b   : > { %1262 = vmatpush1.bf16.msra.mxu0 %v2433_v6  ;;  %v2451_v18 = vld [vmem:[#allocation7 + $0x30] ss:$8 sps:$4 sm:$0xff]   ;;  %v2453_v20 = vld [vmem:[#allocation7 + $0x24] ss:$8 sps:$4 sm:$0xff]   ;;  %v2457_v22 = vld [vmem:[#allocation7 + $0x20] ss:$8 sps:$4 sm:$0xff]  }
  0x6c   : > { %1303 = vmatpush1.bf16.msra.mxu1 %v2434_v7  ;;  %1263 = vmatprep.subr.bf16.mxu0 %v2435_v8  ;;  %v2452_v19 = vld [vmem:[#allocation7 + $0x130] ss:$8 sps:$4 sm:$0xff]   ;;  %v2455_v21 = vld [vmem:[#allocation7 + $0x124] ss:$8 sps:$4 sm:$0xff]   ;;  %v2458_v23 = vld [vmem:[#allocation7 + $0x120] ss:$8 sps:$4 sm:$0xff]  }
  0x6d   : > { %1304 = vmatprep.subr.bf16.mxu1 %v2437_v9  ;;  %v2459_v24 = vld [vmem:[#allocation7 + $0x14] ss:$8 sps:$4 sm:$0xff]   ;;  %v2463_v26 = vld [vmem:[#allocation7 + $0x10] ss:$8 sps:$4 sm:$0xff]   ;;  %v2465_v28 = vld [vmem:[#allocation7 + $0x4] ss:$8 sps:$4 sm:$0xff]  }
  0x6e   : > { %v2461_v25 = vld [vmem:[#allocation7 + $0x114] ss:$8 sps:$4 sm:$0xff]   ;;  %v2464_v27 = vld [vmem:[#allocation7 + $0x110] ss:$8 sps:$4 sm:$0xff]   ;;  %v2467_v29 = vld [vmem:[#allocation7 + $0x104] ss:$8 sps:$4 sm:$0xff]  }
  0x6f   : > { %1264 = vmatpush1.bf16.msra.mxu0 %v2439_v10  ;;  %v2469_v30 = vld [vmem:[#allocation7] ss:$8 sps:$4 sm:$0xff]   ;;  %v2471_v32 = vld [vmem:[#allocation7 + $0xf4] ss:$8 sps:$4 sm:$0xff]   ;;  %v2475_v34 = vld [vmem:[#allocation7 + $0xf0] ss:$8 sps:$4 sm:$0xff]  }
  0x70   : > { %1305 = vmatpush1.bf16.msra.mxu1 %v2440_v11  ;;  %1265 = vmatprep.subr.bf16.mxu0 %v2441_v12  ;;  %v2470_v31 = vld [vmem:[#allocation7 + $0x100] ss:$8 sps:$4 sm:$0xff]   ;;  %v2473_v33 = vld [vmem:[#allocation7 + $0x1f4] ss:$8 sps:$4 sm:$0xff]   ;;  %v2476_v35 = vld [vmem:[#allocation7 + $0x1f0] ss:$8 sps:$4 sm:$0xff]  }
  0x71   : > { %1306 = vmatprep.subr.bf16.mxu1 %v2443_v13  ;;  %v2941_v37 = vmov 1966171168   ;;  %v2477_v39 = vld [vmem:[#allocation7 + $0xe4] ss:$8 sps:$4 sm:$0xff]   ;;  %v2481_v41 = vld [vmem:[#allocation7 + $0xe0] ss:$8 sps:$4 sm:$0xff]  }
  0x72   : > { %v564_v38 = vunpack.c.l.s4 %v2941_v37  ;;  %v2479_v40 = vld [vmem:[#allocation7 + $0x1e4] ss:$8 sps:$4 sm:$0xff]   ;;  %v3141_v42 = vshrl.u32 %v521_v36, 7  ;;  %v2482_v44 = vld [vmem:[#allocation7 + $0x1e0] ss:$8 sps:$4 sm:$0xff]   ;;  %v392_v52 = vld [vmem:[#allocation6] sm:$0xff] }
  0x73   : > { %1266 = vmatpush1.bf16.msra.mxu0 %v2445_v14  ;;  %v2483_v45 = vld [vmem:[#allocation7 + $0xd4] ss:$8 sps:$4 sm:$0xff]   ;;  %v2487_v47 = vld [vmem:[#allocation7 + $0xd0] ss:$8 sps:$4 sm:$0xff]   ;;  %v2489_v50 = vld [vmem:[#allocation7 + $0xc4] ss:$8 sps:$4 sm:$0xff]   ;;  %v562_v54 = vcombine.high %v392_v52, %v392_v52 }
  0x74   : > { %1307 = vmatpush1.bf16.msra.mxu1 %v2446_v15  ;;  %1267 = vmatprep.subr.bf16.mxu0 %v2447_v16  ;;  %v565_v43 = vunpack.c.0.s8 %v564_v38  ;;  %v2485_v46 = vld [vmem:[#allocation7 + $0x1d4] ss:$8 sps:$4 sm:$0xff]   ;;  %v2488_v48 = vld [vmem:[#allocation7 + $0x1d0] ss:$8 sps:$4 sm:$0xff]   ;;  %v2491_v51 = vld [vmem:[#allocation7 + $0x1c4] ss:$8 sps:$4 sm:$0xff]  }
  0x75   : > { %1308 = vmatprep.subr.bf16.mxu1 %v2449_v17  ;;  %v2493_v53 = vld [vmem:[#allocation7 + $0xc0] ss:$8 sps:$4 sm:$0xff]   ;;  %v2495_v57 = vld [vmem:[#allocation7 + $0xb4] ss:$8 sps:$4 sm:$0xff]   ;;  %v2499_v61 = vld [vmem:[#allocation7 + $0xb0] ss:$8 sps:$4 sm:$0xff]  }
  0x76   : > { %v568_v49 = vsub.s32 %v565_v43, %v3141_v42  ;;  %v2494_v56 = vld [vmem:[#allocation7 + $0x1c0] ss:$8 sps:$4 sm:$0xff]   ;;  %v2497_v58 = vld [vmem:[#allocation7 + $0x1b4] ss:$8 sps:$4 sm:$0xff]   ;;  %v2500_v0 = vld [vmem:[#allocation7 + $0x1b0] ss:$8 sps:$4 sm:$0xff]  }
  0x77   : > { %1268 = vmatpush1.bf16.msra.mxu0 %v2451_v18  ;;  %v2501_v1 = vld [vmem:[#allocation7 + $0xa4] ss:$8 sps:$4 sm:$0xff]   ;;  %v2505_v4 = vld [vmem:[#allocation7 + $0xa0] ss:$8 sps:$4 sm:$0xff]   ;;  %v2507_v6 = vld [vmem:[#allocation7 + $0x94] ss:$8 sps:$4 sm:$0xff]  }
  0x78   : > { %1309 = vmatpush1.bf16.msra.mxu1 %v2452_v19  ;;  %1269 = vmatprep.subr.bf16.mxu0 %v2453_v20  ;;  %v569_v55 = vrot.slane %v392_v52, %v568_v49  ;;  %v576_v60 = vrot.slane %v562_v54, %v568_v49  ;;  %v2503_v2 = vld [vmem:[#allocation7 + $0x1a4] ss:$8 sps:$4 sm:$0xff]   ;;  %v2506_v5 = vld [vmem:[#allocation7 + $0x1a0] ss:$8 sps:$4 sm:$0xff]   ;;  %v2509_v7 = vld [vmem:[#allocation7 + $0x194] ss:$8 sps:$4 sm:$0xff]  }
  0x79   : > { %1310 = vmatprep.subr.bf16.mxu1 %v2455_v21  ;;  %v2511_v8 = vld [vmem:[#allocation7 + $0x90] ss:$8 sps:$4 sm:$0xff]   ;;  %v2513_v10 = vld [vmem:[#allocation7 + $0x84] ss:$8 sps:$4 sm:$0xff]   ;;  %v2517_v13 = vld [vmem:[#allocation7 + $0x80] ss:$8 sps:$4 sm:$0xff]  }
  0x7a   : > { %v577_v59 = vcombine.high %v569_v55, %v569_v55  ;;  %v3144_v63 = vrot.slane %v576_v60, %v568_v49  ;;  %v2512_v9 = vld [vmem:[#allocation7 + $0x190] ss:$8 sps:$4 sm:$0xff]   ;;  %v2515_v11 = vld [vmem:[#allocation7 + $0x184] ss:$8 sps:$4 sm:$0xff]   ;;  %v578_v12 = vcombine.high %v576_v60, %v576_v60  ;;  %v585_v14 = vrot.slane %v569_v55, %v568_v49  ;;  %v2518_v15 = vld [vmem:[#allocation7 + $0x180] ss:$8 sps:$4 sm:$0xff]  }
  0x7b   : > { %1270 = vmatpush1.bf16.msra.mxu0 %v2457_v22  ;;  %v2522_v16 = vld [vmem:[#allocation7 + $0x274] ss:$8 sps:$4 sm:$0xff]   ;;  %v2520_v20 = vld [vmem:[#allocation7 + $0x270] ss:$8 sps:$4 sm:$0xff]   ;;  %v2528_v22 = vld [vmem:[#allocation7 + $0x264] ss:$8 sps:$4 sm:$0xff]  }
  0x7c   : > { %1311 = vmatpush1.bf16.msra.mxu1 %v2458_v23  ;;  %1271 = vmatprep.subr.bf16.mxu0 %v2459_v24  ;;  %v599_v62 = vrot.slane %v577_v59, %v568_v49  ;;  %v2525_v17 = vld [vmem:[#allocation7 + $0x374] ss:$8 sps:$4 sm:$0xff]   ;;  %v606_v18 = vrot.slane %v578_v12, %v568_v49  ;;  %v607_v19 = vcombine.high %v585_v14, %v585_v14  ;;  %v2523_v21 = vld [vmem:[#allocation7 + $0x370] ss:$8 sps:$4 sm:$0xff]   ;;  %v2531_v23 = vld [vmem:[#allocation7 + $0x364] ss:$8 sps:$4 sm:$0xff]  }
  0x7d   : > { %1312 = vmatprep.subr.bf16.mxu1 %v2461_v25  ;;  %v2526_v25 = vld [vmem:[#allocation7 + $0x260] ss:$8 sps:$4 sm:$0xff]   ;;  %v2549_v36 = vld [vmem:[#allocation7 + $0x334] ss:$8 sps:$4 sm:$0xff]   ;;  %v2544_v37 = vld [vmem:[#allocation7 + $0x230] ss:$8 sps:$4 sm:$0xff]  }
  0x7e   : > { %v609_v3 = vcombine.high %v599_v62, %v599_v62  ;;  %1291 = vmatprep.mubr.bf16.mxu0 %v599_v62  ;;  %v610_v24 = vcombine.high %v606_v18, %v606_v18  ;;  %v2547_v38 = vld [vmem:[#allocation7 + $0x330] ss:$8 sps:$4 sm:$0xff]   ;;  %v2553_v43 = vld [vmem:[#allocation7 + $0x320] ss:$8 sps:$4 sm:$0xff]   ;;  %v2567_v49 = vld [vmem:[#allocation7 + $0x304] ss:$8 sps:$4 sm:$0xff]  }
  0x7f   : > { %1272 = vmatpush1.bf16.msra.mxu0 %v2463_v26  ;;  %v2529_v26 = vld [vmem:[#allocation7 + $0x360] ss:$8 sps:$4 sm:$0xff]   ;;  %v2570_v52 = vld [vmem:[#allocation7 + $0x2f4] ss:$8 sps:$4 sm:$0xff]   ;;  %v2568_v54 = vld [vmem:[#allocation7 + $0x2f0] ss:$8 sps:$4 sm:$0xff]  }
  0x80   : > { %1313 = vmatpush1.bf16.msra.mxu1 %v2464_v27  ;;  %1273 = vmatprep.subr.bf16.mxu0 %v2465_v28  ;;  %v2534_v27 = vld [vmem:[#allocation7 + $0x254] ss:$8 sps:$4 sm:$0xff]   ;;  %v2571_v55 = vld [vmem:[#allocation7 + $0x3f0] ss:$8 sps:$4 sm:$0xff]   ;;  %v2577_v59 = vld [vmem:[#allocation7 + $0x3e0] ss:$8 sps:$4 sm:$0xff]  }
  0x81   : > { %1314 = vmatprep.subr.bf16.mxu1 %v2467_v29  ;;  %1332 = vmatprep.mubr.bf16.mxu1 %v609_v3  ;;  %v2537_v28 = vld [vmem:[#allocation7 + $0x354] ss:$8 sps:$4 sm:$0xff]   ;;  %v2532_v29 = vld [vmem:[#allocation7 + $0x250] ss:$8 sps:$4 sm:$0xff]   ;;  %v2586_v3 = vld [vmem:[#allocation7 + $0x2c0] ss:$8 sps:$4 sm:$0xff]  }
  0x82   : > { %v2582_v60 = vld [vmem:[#allocation7 + $0x2d4] ss:$8 sps:$4 sm:$0xff]   ;;  %v2580_v62 = vld [vmem:[#allocation7 + $0x2d0] ss:$8 sps:$4 sm:$0xff]   ;;  %v2601_v12 = vld [vmem:[#allocation7 + $0x3a0] ss:$8 sps:$4 sm:$0xff]  }
  0x83   : > { %1274 = vmatpush1.bf16.msra.mxu0 %v2469_v30  ;;  %v2535_v30 = vld [vmem:[#allocation7 + $0x350] ss:$8 sps:$4 sm:$0xff]   ;;  %s525_s9 = sld [smem:[#allocation2]]  ;;  %vm523_vm0 = vcmp.eq.s32.totalorder %v3141_v42, 0  ;;  %vm528_vm1 = vcmp.eq.s32.totalorder %v3141_v42, 1  ;;  %s2112_s30 = sshll.u32 %s2921_s27, 2 }
  0x84   : > { %1315 = vmatpush1.bf16.msra.mxu1 %v2470_v31  ;;  %1275 = vmatprep.subr.bf16.mxu0 %v2471_v32  ;;  %v2540_v31 = vld [vmem:[#allocation7 + $0x244] ss:$8 sps:$4 sm:$0xff]   ;;  %s2113_s11 = sld [smem:[#allocation2 + $0x1]]  ;;  %p387_p1 = scmp.lt.s32.totalorder %s2112_s30, 7 }
  0x85   : > { %1316 = vmatprep.subr.bf16.mxu1 %v2473_v33  ;;  %v2543_v32 = vld [vmem:[#allocation7 + $0x344] ss:$8 sps:$4 sm:$0xff]   ;;  %v2538_v33 = vld [vmem:[#allocation7 + $0x240] ss:$8 sps:$4 sm:$0xff]   ;;  %s2111_s19 = sshll.u32 %s3131_s0, 3  ;;  %s2312_s15 = sshll.u32 %s2921_s27, 7 }
  0x86   : > { %s3302_s30 = smov (!%p387_p1, %s2112_s30), 7  ;;  %s384_s21 = scalar_lea.vmem [#allocation12], %s2111_s19 }
  0x87   : > { %1276 = vmatpush2.bf16.msra.mxu0 %v2475_v34  ;;  %v2541_v34 = vld [vmem:[#allocation7 + $0x340] ss:$8 sps:$4 sm:$0xff]   ;;  %s389_s8 = scalar_lea.vmem %s3274_s6, %s3302_s30  ;;  %s1959_s22 = sshll.u32 %s384_s21, 4  ;;  %s1960_s22 = int_to_ptr.vmem [resolvable:$true] %s1959_s22 }
  0x88   : > { %1317 = vmatpush2.bf16.msra.mxu1 %v2476_v35  ;;  %1277 = vmatprep.subr.bf16.mxu0 %v2477_v39  ;;  %v2546_v35 = vld [vmem:[#allocation7 + $0x234] ss:$8 sps:$4 sm:$0xff]   ;;  %v2552_v39 = vld [vmem:[#allocation7 + $0x224] ss:$8 sps:$4 sm:$0xff]   ;;  %s2943_s17 = smov [#allocation12]  }
  0x89   : > { %1318 = vmatprep.subr.bf16.mxu1 %v2479_v40  ;;  %v2555_v40 = vld [vmem:[#allocation7 + $0x324] ss:$8 sps:$4 sm:$0xff]   ;;  %s2841_s23 = sshll.u32 %s2943_s17, 4  ;;  %s2842_s23 = int_to_ptr.vmem [resolvable:$false] %s2841_s23 }
  0x8a   : > { %s2843_s27 = scalar_lea.vmem %s2842_s23, 256  ;;  %p2844_p2 = scmp.lt.s32.totalorder %s1960_s22, %s2842_s23 }
  0x8b   : > { %1278 = vmatpush2.bf16.msra.mxu0 %v2481_v41  ;;  %v2550_v41 = vld [vmem:[#allocation7 + $0x220] ss:$8 sps:$4 sm:$0xff]  }
  0x8c   : > { %1319 = vmatpush2.bf16.msra.mxu1 %v2482_v44  ;;  %1279 = vmatprep.subr.bf16.mxu0 %v2483_v45  ;;  %v2558_v44 = vld [vmem:[#allocation7 + $0x214] ss:$8 sps:$4 sm:$0xff]  }
  0x8d   : > { %1320 = vmatprep.subr.bf16.mxu1 %v2485_v46  ;;  %v2561_v45 = vld [vmem:[#allocation7 + $0x314] ss:$8 sps:$4 sm:$0xff]   ;;  %v2556_v46 = vld [vmem:[#allocation7 + $0x210] ss:$8 sps:$4 sm:$0xff]  }
  0x8f   : > { %1280 = vmatpush2.bf16.msra.mxu0 %v2487_v47  ;;  %v2559_v47 = vld [vmem:[#allocation7 + $0x310] ss:$8 sps:$4 sm:$0xff]  }
  0x90   : > { %1321 = vmatpush2.bf16.msra.mxu1 %v2488_v48  ;;  %1281 = vmatprep.subr.bf16.mxu0 %v2489_v50  ;;  %v2564_v48 = vld [vmem:[#allocation7 + $0x204] ss:$8 sps:$4 sm:$0xff]   ;;  %v2562_v50 = vld [vmem:[#allocation7 + $0x200] ss:$8 sps:$4 sm:$0xff]  }
  0x91   : > { %1322 = vmatprep.subr.bf16.mxu1 %v2491_v51  ;;  %v2565_v51 = vld [vmem:[#allocation7 + $0x300] ss:$8 sps:$4 sm:$0xff]  }
  0x93   : > { %1282 = vmatpush2.bf16.msra.mxu0 %v2493_v53  ;;  %v2573_v53 = vld [vmem:[#allocation7 + $0x3f4] ss:$8 sps:$4 sm:$0xff]  }
  0x94   : > { %1323 = vmatpush2.bf16.msra.mxu1 %v2494_v56  ;;  %1283 = vmatprep.subr.bf16.mxu0 %v2495_v57  ;;  %v2576_v56 = vld [vmem:[#allocation7 + $0x2e4] ss:$8 sps:$4 sm:$0xff]  }
  0x95   : > { %1324 = vmatprep.subr.bf16.mxu1 %v2497_v58  ;;  %v2579_v57 = vld [vmem:[#allocation7 + $0x3e4] ss:$8 sps:$4 sm:$0xff]   ;;  %v2574_v58 = vld [vmem:[#allocation7 + $0x2e0] ss:$8 sps:$4 sm:$0xff]  }
  0x97   : > { %1284 = vmatpush2.bf16.msra.mxu0 %v2499_v61  ;;  %v2585_v61 = vld [vmem:[#allocation7 + $0x3d4] ss:$8 sps:$4 sm:$0xff]  }
  0x98   : > { %1325 = vmatpush2.bf16.msra.mxu1 %v2500_v0  ;;  %1285 = vmatprep.subr.bf16.mxu0 %v2501_v1  ;;  %v2583_v0 = vld [vmem:[#allocation7 + $0x3d0] ss:$8 sps:$4 sm:$0xff]   ;;  %v2588_v1 = vld [vmem:[#allocation7 + $0x2c4] ss:$8 sps:$4 sm:$0xff]  }
  0x99   : > { %1326 = vmatprep.subr.bf16.mxu1 %v2503_v2  ;;  %v2591_v2 = vld [vmem:[#allocation7 + $0x3c4] ss:$8 sps:$4 sm:$0xff]  }
  0x9b   : > { %1286 = vmatpush2.bf16.msra.mxu0 %v2505_v4  ;;  %v2589_v4 = vld [vmem:[#allocation7 + $0x3c0] ss:$8 sps:$4 sm:$0xff]  }
  0x9c   : > { %1327 = vmatpush2.bf16.msra.mxu1 %v2506_v5  ;;  %1287 = vmatprep.subr.bf16.mxu0 %v2507_v6  ;;  %v2594_v5 = vld [vmem:[#allocation7 + $0x2b4] ss:$8 sps:$4 sm:$0xff]  }
  0x9d   : > { %1328 = vmatprep.subr.bf16.mxu1 %v2509_v7  ;;  %v2597_v6 = vld [vmem:[#allocation7 + $0x3b4] ss:$8 sps:$4 sm:$0xff]   ;;  %v2592_v7 = vld [vmem:[#allocation7 + $0x2b0] ss:$8 sps:$4 sm:$0xff]  }
  0x9f   : > { %1288 = vmatpush2.bf16.msra.mxu0 %v2511_v8  ;;  %v2595_v8 = vld [vmem:[#allocation7 + $0x3b0] ss:$8 sps:$4 sm:$0xff]  }
  0xa0   : > { %1329 = vmatpush2.bf16.msra.mxu1 %v2512_v9  ;;  %1289 = vmatprep.subr.bf16.mxu0 %v2513_v10  ;;  %v2600_v9 = vld [vmem:[#allocation7 + $0x2a4] ss:$8 sps:$4 sm:$0xff]  }
  0xa1   : > { %1330 = vmatprep.subr.bf16.mxu1 %v2515_v11  ;;  %v2603_v10 = vld [vmem:[#allocation7 + $0x3a4] ss:$8 sps:$4 sm:$0xff]   ;;  %v2598_v11 = vld [vmem:[#allocation7 + $0x2a0] ss:$8 sps:$4 sm:$0xff]  }
  0xa3   : > { %1290 = vmatpush2.bf16.msra.mxu0 %v2517_v13  ;;  %v2606_v13 = vld [vmem:[#allocation7 + $0x294] ss:$8 sps:$4 sm:$0xff]  }
  0xa4   : > { %1331 = vmatpush2.bf16.msra.mxu1 %v2518_v15  ;;  %1341 = vmatprep.subr.bf16.mxu0 %v2522_v16  ;;  %v2604_v15 = vld [vmem:[#allocation7 + $0x290] ss:$8 sps:$4 sm:$0xff]  }
  0xa5   : > { %1382 = vmatprep.subr.bf16.mxu1 %v2525_v17  ;;  %v2607_v16 = vld [vmem:[#allocation7 + $0x390] ss:$8 sps:$4 sm:$0xff]   ;;  %v2612_v17 = vld [vmem:[#allocation7 + $0x284] ss:$8 sps:$4 sm:$0xff]  }
  0xa6   : > { %1292 = vmatmul.mubr.bf16.vlgmr.msra.gmra.mxu0 %v585_v14  ;;  %v2609_v14 = vld [vmem:[#allocation7 + $0x394] ss:$8 sps:$4 sm:$0xff]  }
  0xa7   : > { %1333 = vmatmul.mubr.bf16.vlgmr.msra.gmra.mxu1 %v607_v19  ;;  %1342 = vmatpush1.bf16.msra.mxu0 %v2520_v20  ;;  %v2610_v19 = vld [vmem:[#allocation7 + $0x280] ss:$8 sps:$4 sm:$0xff]  }
  0xa8   : > { %1383 = vmatpush1.bf16.msra.mxu1 %v2523_v21  ;;  %1343 = vmatprep.subr.bf16.mxu0 %v2528_v22  ;;  %v2613_v20 = vld [vmem:[#allocation7 + $0x380] ss:$8 sps:$4 sm:$0xff]   ;;  %v608_v21 = vcombine.high %v3144_v63, %v3144_v63 }
  0xa9   : > { %1384 = vmatprep.subr.bf16.mxu1 %v2531_v23  ;;  %1373 = vmatprep.mubr.bf16.mxu0 %v606_v18  ;;  %v2615_v18 = vld [vmem:[#allocation7 + $0x384] ss:$8 sps:$4 sm:$0xff]  }
  0xaa   : > { %1414 = vmatprep.mubr.bf16.mxu1 %v610_v24  ;;  %v2616_v22 = vld [vmem:[%s3135_s13 + $0xe0] ss:$16 sps:$4 sm:$0xff]   ;;  %v2618_v23 = vld [vmem:[%s3135_s13 + $0xe4] ss:$16 sps:$4 sm:$0xff]   ;;  %v2619_v24 = vld [vmem:[%s3135_s13 + $0xe8] ss:$16 sps:$4 sm:$0xff]  }
  0xab   : > { %1344 = vmatpush1.bf16.msra.mxu0 %v2526_v25  ;;  %v2621_v25 = vld [vmem:[%s3135_s13 + $0xec] ss:$16 sps:$4 sm:$0xff]  }
  0xac   : > { %1385 = vmatpush1.bf16.msra.mxu1 %v2529_v26  ;;  %1345 = vmatprep.subr.bf16.mxu0 %v2534_v27  ;;  %v2624_v26 = vld [vmem:[%s3135_s13 + $0xc4] ss:$16 sps:$4 sm:$0xff]   ;;  %v2627_v27 = vld [vmem:[%s3135_s13 + $0xcc] ss:$16 sps:$4 sm:$0xff]  }
  0xad   : > { %1386 = vmatprep.subr.bf16.mxu1 %v2537_v28  ;;  %v2622_v28 = vld [vmem:[%s3135_s13 + $0xc0] ss:$16 sps:$4 sm:$0xff]  }
  0xaf   : > { %1346 = vmatpush1.bf16.msra.mxu0 %v2532_v29  ;;  %v2630_v29 = vld [vmem:[%s3135_s13 + $0xa4] ss:$16 sps:$4 sm:$0xff]  }
  0xb0   : > { %1387 = vmatpush1.bf16.msra.mxu1 %v2535_v30  ;;  %1347 = vmatprep.subr.bf16.mxu0 %v2540_v31  ;;  %v2633_v30 = vld [vmem:[%s3135_s13 + $0xac] ss:$16 sps:$4 sm:$0xff]   ;;  %v2628_v31 = vld [vmem:[%s3135_s13 + $0xa0] ss:$16 sps:$4 sm:$0xff]  }
  0xb1   : > { %1388 = vmatprep.subr.bf16.mxu1 %v2543_v32  ;;  %v2631_v32 = vld [vmem:[%s3135_s13 + $0xa8] ss:$16 sps:$4 sm:$0xff]  }
  0xb3   : > { %1348 = vmatpush1.bf16.msra.mxu0 %v2538_v33  ;;  %v2636_v33 = vld [vmem:[%s3135_s13 + $0x84] ss:$16 sps:$4 sm:$0xff]  }
  0xb4   : > { %1389 = vmatpush1.bf16.msra.mxu1 %v2541_v34  ;;  %1349 = vmatprep.subr.bf16.mxu0 %v2546_v35  ;;  %v2639_v34 = vld [vmem:[%s3135_s13 + $0x8c] ss:$16 sps:$4 sm:$0xff]   ;;  %v2634_v35 = vld [vmem:[%s3135_s13 + $0x80] ss:$16 sps:$4 sm:$0xff]  }
  0xb5   : > { %1390 = vmatprep.subr.bf16.mxu1 %v2549_v36  ;;  %v2637_v36 = vld [vmem:[%s3135_s13 + $0x88] ss:$16 sps:$4 sm:$0xff]  }
  0xb7   : > { %1350 = vmatpush1.bf16.msra.mxu0 %v2544_v37  ;;  %v2642_v37 = vld [vmem:[%s3135_s13 + $0x64] ss:$16 sps:$4 sm:$0xff]  }
  0xb8   : > { %1391 = vmatpush1.bf16.msra.mxu1 %v2547_v38  ;;  %1351 = vmatprep.subr.bf16.mxu0 %v2552_v39  ;;  %v2645_v38 = vld [vmem:[%s3135_s13 + $0x6c] ss:$16 sps:$4 sm:$0xff]   ;;  %v2640_v39 = vld [vmem:[%s3135_s13 + $0x60] ss:$16 sps:$4 sm:$0xff]  }
  0xb9   : > { %1392 = vmatprep.subr.bf16.mxu1 %v2555_v40  ;;  %v2643_v40 = vld [vmem:[%s3135_s13 + $0x68] ss:$16 sps:$4 sm:$0xff]  }
  0xbb   : > { %1352 = vmatpush1.bf16.msra.mxu0 %v2550_v41  ;;  %v2648_v41 = vld [vmem:[%s3135_s13 + $0x44] ss:$16 sps:$4 sm:$0xff]  }
  0xbc   : > { %1393 = vmatpush1.bf16.msra.mxu1 %v2553_v43  ;;  %1353 = vmatprep.subr.bf16.mxu0 %v2558_v44  ;;  %v2651_v43 = vld [vmem:[%s3135_s13 + $0x4c] ss:$16 sps:$4 sm:$0xff]   ;;  %v2646_v44 = vld [vmem:[%s3135_s13 + $0x40] ss:$16 sps:$4 sm:$0xff]  }
  0xbd   : > { %1394 = vmatprep.subr.bf16.mxu1 %v2561_v45  ;;  %v2649_v45 = vld [vmem:[%s3135_s13 + $0x48] ss:$16 sps:$4 sm:$0xff]  }
  0xbf   : > { %1354 = vmatpush1.bf16.msra.mxu0 %v2556_v46  ;;  %v2654_v46 = vld [vmem:[%s3135_s13 + $0x24] ss:$16 sps:$4 sm:$0xff]  }
  0xc0   : > { %1395 = vmatpush1.bf16.msra.mxu1 %v2559_v47  ;;  %1355 = vmatprep.subr.bf16.mxu0 %v2564_v48  ;;  %v2657_v47 = vld [vmem:[%s3135_s13 + $0x2c] ss:$16 sps:$4 sm:$0xff]   ;;  %v2652_v48 = vld [vmem:[%s3135_s13 + $0x20] ss:$16 sps:$4 sm:$0xff]  }
  0xc1   : > { %1396 = vmatprep.subr.bf16.mxu1 %v2567_v49  ;;  %v2655_v49 = vld [vmem:[%s3135_s13 + $0x28] ss:$16 sps:$4 sm:$0xff]  }
  0xc3   : > { %1356 = vmatpush1.bf16.msra.mxu0 %v2562_v50  ;;  %v2660_v50 = vld [vmem:[%s3135_s13 + $0x4] ss:$16 sps:$4 sm:$0xff]  }
  0xc4   : > { %1397 = vmatpush1.bf16.msra.mxu1 %v2565_v51  ;;  %1357 = vmatprep.subr.bf16.mxu0 %v2570_v52  ;;  %v2663_v51 = vld [vmem:[%s3135_s13 + $0xc] ss:$16 sps:$4 sm:$0xff]   ;;  %v2658_v52 = vld [vmem:[%s3135_s13] ss:$16 sps:$4 sm:$0xff]  }
  0xc5   : > { %1398 = vmatprep.subr.bf16.mxu1 %v2573_v53  ;;  %v2661_v53 = vld [vmem:[%s3135_s13 + $0x8] ss:$16 sps:$4 sm:$0xff]  }
  0xc7   : > { %1358 = vmatpush2.bf16.msra.mxu0 %v2568_v54  ;;  %v2666_v54 = vld [vmem:[%s3135_s13 + $0x1e4] ss:$16 sps:$4 sm:$0xff]  }
  0xc8   : > { %1399 = vmatpush2.bf16.msra.mxu1 %v2571_v55  ;;  %1359 = vmatprep.subr.bf16.mxu0 %v2576_v56  ;;  %v2669_v55 = vld [vmem:[%s3135_s13 + $0x1ec] ss:$16 sps:$4 sm:$0xff]   ;;  %v2664_v56 = vld [vmem:[%s3135_s13 + $0x1e0] ss:$16 sps:$4 sm:$0xff]  }
  0xc9   : > { %1400 = vmatprep.subr.bf16.mxu1 %v2579_v57  ;;  %v2667_v57 = vld [vmem:[%s3135_s13 + $0x1e8] ss:$16 sps:$4 sm:$0xff]  }
  0xcb   : > { %1360 = vmatpush2.bf16.msra.mxu0 %v2574_v58  ;;  %v2672_v58 = vld [vmem:[%s3135_s13 + $0x1c4] ss:$16 sps:$4 sm:$0xff]  }
  0xcc   : > { %1401 = vmatpush2.bf16.msra.mxu1 %v2577_v59  ;;  %1361 = vmatprep.subr.bf16.mxu0 %v2582_v60  ;;  %v2675_v59 = vld [vmem:[%s3135_s13 + $0x1cc] ss:$16 sps:$4 sm:$0xff]   ;;  %v2670_v60 = vld [vmem:[%s3135_s13 + $0x1c0] ss:$16 sps:$4 sm:$0xff]  }
  0xcd   : > { %1402 = vmatprep.subr.bf16.mxu1 %v2585_v61  ;;  %v2673_v61 = vld [vmem:[%s3135_s13 + $0x1c8] ss:$16 sps:$4 sm:$0xff]  }
  0xcf   : > { %1362 = vmatpush2.bf16.msra.mxu0 %v2580_v62  ;;  %v2678_v62 = vld [vmem:[%s3135_s13 + $0x1a4] ss:$16 sps:$4 sm:$0xff]  }
  0xd0   : > { %1403 = vmatpush2.bf16.msra.mxu1 %v2583_v0  ;;  %1363 = vmatprep.subr.bf16.mxu0 %v2588_v1  ;;  %v2681_v0 = vld [vmem:[%s3135_s13 + $0x1ac] ss:$16 sps:$4 sm:$0xff]   ;;  %v2676_v1 = vld [vmem:[%s3135_s13 + $0x1a0] ss:$16 sps:$4 sm:$0xff]  }
  0xd1   : > { %1404 = vmatprep.subr.bf16.mxu1 %v2591_v2  ;;  %v2679_v2 = vld [vmem:[%s3135_s13 + $0x1a8] ss:$16 sps:$4 sm:$0xff]  }
  0xd3   : > { %1364 = vmatpush2.bf16.msra.mxu0 %v2586_v3  ;;  %v2684_v3 = vld [vmem:[%s3135_s13 + $0x184] ss:$16 sps:$4 sm:$0xff]  }
  0xd4   : > { %1405 = vmatpush2.bf16.msra.mxu1 %v2589_v4  ;;  %1365 = vmatprep.subr.bf16.mxu0 %v2594_v5  ;;  %v2687_v4 = vld [vmem:[%s3135_s13 + $0x18c] ss:$16 sps:$4 sm:$0xff]   ;;  %v2682_v5 = vld [vmem:[%s3135_s13 + $0x180] ss:$16 sps:$4 sm:$0xff]  }
  0xd5   : > { %1406 = vmatprep.subr.bf16.mxu1 %v2597_v6  ;;  %v2685_v6 = vld [vmem:[%s3135_s13 + $0x188] ss:$16 sps:$4 sm:$0xff]  }
  0xd7   : > { %1366 = vmatpush2.bf16.msra.mxu0 %v2592_v7  ;;  %v2690_v7 = vld [vmem:[%s3135_s13 + $0x164] ss:$16 sps:$4 sm:$0xff]  }
  0xd8   : > { %1407 = vmatpush2.bf16.msra.mxu1 %v2595_v8  ;;  %1367 = vmatprep.subr.bf16.mxu0 %v2600_v9  ;;  %v2693_v8 = vld [vmem:[%s3135_s13 + $0x16c] ss:$16 sps:$4 sm:$0xff]   ;;  %v2688_v9 = vld [vmem:[%s3135_s13 + $0x160] ss:$16 sps:$4 sm:$0xff]  }
  0xd9   : > { %1408 = vmatprep.subr.bf16.mxu1 %v2603_v10  ;;  %v2691_v10 = vld [vmem:[%s3135_s13 + $0x168] ss:$16 sps:$4 sm:$0xff]  }
  0xdb   : > { %1368 = vmatpush2.bf16.msra.mxu0 %v2598_v11  ;;  %v2696_v11 = vld [vmem:[%s3135_s13 + $0x144] ss:$16 sps:$4 sm:$0xff]  }
  0xdc   : > { %1409 = vmatpush2.bf16.msra.mxu1 %v2601_v12  ;;  %1369 = vmatprep.subr.bf16.mxu0 %v2606_v13  ;;  %v2699_v12 = vld [vmem:[%s3135_s13 + $0x14c] ss:$16 sps:$4 sm:$0xff]   ;;  %v2694_v13 = vld [vmem:[%s3135_s13 + $0x140] ss:$16 sps:$4 sm:$0xff]  }
  0xdd   : > { %1410 = vmatprep.subr.bf16.mxu1 %v2609_v14  ;;  %v2697_v14 = vld [vmem:[%s3135_s13 + $0x148] ss:$16 sps:$4 sm:$0xff]  }
  0xdf   : > { %1370 = vmatpush2.bf16.msra.mxu0 %v2604_v15  ;;  %v2702_v15 = vld [vmem:[%s3135_s13 + $0x124] ss:$16 sps:$4 sm:$0xff]  }
  0xe0   : > { %1411 = vmatpush2.bf16.msra.mxu1 %v2607_v16  ;;  %1371 = vmatprep.subr.bf16.mxu0 %v2612_v17  ;;  %v2705_v16 = vld [vmem:[%s3135_s13 + $0x12c] ss:$16 sps:$4 sm:$0xff]   ;;  %v2700_v17 = vld [vmem:[%s3135_s13 + $0x120] ss:$16 sps:$4 sm:$0xff]  }
  0xe1   : > { %1412 = vmatprep.subr.bf16.mxu1 %v2615_v18  ;;  %v2703_v18 = vld [vmem:[%s3135_s13 + $0x128] ss:$16 sps:$4 sm:$0xff]  }
  0xe3   : > { %1372 = vmatpush2.bf16.msra.mxu0 %v2610_v19  ;;  %v2708_v19 = vld [vmem:[%s3135_s13 + $0x104] ss:$16 sps:$4 sm:$0xff]  }
  0xe4   : > { %1413 = vmatpush2.bf16.msra.mxu1 %v2613_v20  ;;  %1833 = vmatprep.subr.bf16.mxu0 %v2618_v23  ;;  %v2711_v20 = vld [vmem:[%s3135_s13 + $0x10c] ss:$16 sps:$4 sm:$0xff]  }
  0xe5   : > { %1874 = vmatprep.subr.bf16.mxu1 %v2621_v25 }
  0xe6   : > { %1374 = vmatmul.mubr.bf16.vlgmr.msra.gmra.mxu0 %v3144_v63  ;;  %v2625_v63 = vld [vmem:[%s3135_s13 + $0xc8] ss:$16 sps:$4 sm:$0xff]  }
  0xe7   : > { %1415 = vmatmul.mubr.bf16.vlgmr.msra.gmra.mxu1 %v608_v21  ;;  %1834 = vmatpush1.bf16.msra.mxu0 %v2616_v22  ;;  %v2706_v21 = vld [vmem:[%s3135_s13 + $0x100] ss:$16 sps:$4 sm:$0xff]   ;;  %v2709_v22 = vld [vmem:[%s3135_s13 + $0x108] ss:$16 sps:$4 sm:$0xff]   ;;  %s1957_s13 = scalar_lea.hbm %s3275_s7, %s2312_s15 }
  0xe8   : > { %1875 = vmatpush1.bf16.msra.mxu1 %v2619_v24  ;;  %1835 = vmatprep.subr.bf16.mxu0 %v2624_v26 }
  0xe9   : > { %1876 = vmatprep.subr.bf16.mxu1 %v2627_v27 }
  0xeb   : > { %1836 = vmatpush1.bf16.msra.mxu0 %v2622_v28 }
  0xec   : > { %1877 = vmatpush1.bf16.msra.mxu1 %v2625_v63  ;;  %1837 = vmatprep.subr.bf16.mxu0 %v2630_v29 }
  0xed   : > { %1878 = vmatprep.subr.bf16.mxu1 %v2633_v30  ;;  %v526_v30 = vstv %s525_s9  ;;  %s1943_s9 = scalar_lea.sflag [#allocation4], %s3131_s0 }
  0xef   : > { %1838 = vmatpush1.bf16.msra.mxu0 %v2628_v31  ;;  %v538_v31 = vsub.s32 0, %v3141_v42 }
  0xf0   : > { %1879 = vmatpush1.bf16.msra.mxu1 %v2631_v32  ;;  %1839 = vmatprep.subr.bf16.mxu0 %v2636_v33  ;;  %v534_v32 = vld [vmem:[%s3270_s2] sm:$0x3]  ;;  %v527_v33 = vsel %vm523_vm0, %v526_v30, 0.0 }
  0xf1   : > { %1880 = vmatprep.subr.bf16.mxu1 %v2639_v34  ;;  %v531_v34 = vstv %s2113_s11  ;;  %s2837_s11 = scalar_lea.vmem %s1960_s22, 128 }
  0xf2   : > { %p2838_p7 = scmp.ne.s32.totalorder %s1960_s22, %s2837_s11  ;;  %p2845_p13 = scmp.lt.s32.totalorder %s2843_s27, %s2837_s11 }
  0xf3   : > { %1840 = vmatpush1.bf16.msra.mxu0 %v2634_v35  ;;  %v542_v35 = vsub.s32 1, %v3141_v42 }
  0xf4   : > { %1881 = vmatpush1.bf16.msra.mxu1 %v2637_v36  ;;  %1841 = vmatprep.subr.bf16.mxu0 %v2642_v37  ;;  %v539_v36 = vrot.slane %v534_v32, %v538_v31  ;;  %v532_v37 = vsel %vm528_vm1, %v531_v34, %v527_v33  ;;  %p2839_p6 = pnand %p2838_p7, %p3092_p9  ;;  %p2846_p10 = por %p2845_p13, %p2844_p2 }
  0xf5   : > { %1882 = vmatprep.subr.bf16.mxu1 %v2645_v38  ;;  %v533_v38 = vld [vmem:[#allocation9] sm:$0x3] }
  0xf6   : > { %p2840_p11 = pneg %p2839_p6 }
  0xf7   : > { %1842 = vmatpush1.bf16.msra.mxu0 %v2640_v39  ;;  %v543_v39 = vrot.slane %v534_v32, %v542_v35 }
  0xf8   : > { %1883 = vmatpush1.bf16.msra.mxu1 %v2643_v40  ;;  %1843 = vmatprep.subr.bf16.mxu0 %v2648_v41  ;;  %v546_v40 = vmul.f32 %v539_v36, %v532_v37  ;;  %v552_v41 = vrot.slane %v533_v38, %v538_v31  ;;  %p2847_p0 = pnand %p2846_p10, %p2840_p11 }
  0xf9   : > { %1884 = vmatprep.subr.bf16.mxu1 %v2651_v43  ;;  %v547_v43 = vmul.f32 %v543_v39, %v532_v37 }
  0xfb   : > { %1844 = vmatpush1.bf16.msra.mxu0 %v2646_v44  ;;  %v556_v44 = vrot.slane %v533_v38, %v542_v35 }
  0xfc   : > { %1885 = vmatpush1.bf16.msra.mxu1 %v2649_v45  ;;  %1845 = vmatprep.subr.bf16.mxu0 %v2654_v46  ;;  %v559_v45 = vadd.f32 %v552_v41, %v546_v40 }
  0xfd   : > { %1886 = vmatprep.subr.bf16.mxu1 %v2657_v47  ;;  %v560_v46 = vadd.f32 %v556_v44, %v547_v43 }
  0xff   : > { %1846 = vmatpush1.bf16.msra.mxu0 %v2652_v48 }
 0x100   : > { %1887 = vmatpush1.bf16.msra.mxu1 %v2655_v49  ;;  %1847 = vmatprep.subr.bf16.mxu0 %v2660_v50 }
 0x101   : > { %1888 = vmatprep.subr.bf16.mxu1 %v2663_v51 }
 0x103   : > { %1848 = vmatpush1.bf16.msra.mxu0 %v2658_v52 }
 0x104   : > { %1889 = vmatpush1.bf16.msra.mxu1 %v2661_v53  ;;  %1849 = vmatprep.subr.bf16.mxu0 %v2666_v54 }
 0x105   : > { %1890 = vmatprep.subr.bf16.mxu1 %v2669_v55 }
 0x107   : > { %1850 = vmatpush2.bf16.msra.mxu0 %v2664_v56 }
 0x108   : > { %1891 = vmatpush2.bf16.msra.mxu1 %v2667_v57  ;;  %1851 = vmatprep.subr.bf16.mxu0 %v2672_v58 }
 0x109   : > { %1892 = vmatprep.subr.bf16.mxu1 %v2675_v59 }
 0x10b   : > { %1852 = vmatpush2.bf16.msra.mxu0 %v2670_v60 }
 0x10c   : > { %1893 = vmatpush2.bf16.msra.mxu1 %v2673_v61  ;;  %1853 = vmatprep.subr.bf16.mxu0 %v2678_v62 }
 0x10d   : > { %1894 = vmatprep.subr.bf16.mxu1 %v2681_v0 }
 0x10f   : > { %1854 = vmatpush2.bf16.msra.mxu0 %v2676_v1 }
 0x110   : > { %1895 = vmatpush2.bf16.msra.mxu1 %v2679_v2  ;;  %1855 = vmatprep.subr.bf16.mxu0 %v2684_v3 }
 0x111   : > { %1896 = vmatprep.subr.bf16.mxu1 %v2687_v4  ;;  %v1503_v4 = vsub.s32 2, %v3141_v42 }
 0x113   : > { %1856 = vmatpush2.bf16.msra.mxu0 %v2682_v5  ;;  %v1491_v5 = vld [vmem:[%s389_s8] sm:$0xf] }
 0x114   : > { %1897 = vmatpush2.bf16.msra.mxu1 %v2685_v6  ;;  %1857 = vmatprep.subr.bf16.mxu0 %v2690_v7  ;;  %v1507_v6 = vsub.s32 3, %v3141_v42  ;;  %v1496_v7 = vrot.slane %v1491_v5, %v538_v31 }
 0x115   : > { %1898 = vmatprep.subr.bf16.mxu1 %v2693_v8  ;;  %v1504_v8 = vrot.slane %v1491_v5, %v1503_v4 }
 0x117   : > { %1858 = vmatpush2.bf16.msra.mxu0 %v2688_v9  ;;  %v1500_v9 = vrot.slane %v1491_v5, %v542_v35 }
 0x118   : > { %1899 = vmatpush2.bf16.msra.mxu1 %v2691_v10  ;;  %1859 = vmatprep.subr.bf16.mxu0 %v2696_v11  ;;  %v1508_v10 = vrot.slane %v1491_v5, %v1507_v6 }
 0x119   : > { %1900 = vmatprep.subr.bf16.mxu1 %v2699_v12 }
 0x11b   : > { %1860 = vmatpush2.bf16.msra.mxu0 %v2694_v13 }
 0x11c   : > { %1901 = vmatpush2.bf16.msra.mxu1 %v2697_v14  ;;  %1861 = vmatprep.subr.bf16.mxu0 %v2702_v15 }
 0x11d   : > { %1902 = vmatprep.subr.bf16.mxu1 %v2705_v16 }
 0x11f   : > { %1862 = vmatpush2.bf16.msra.mxu0 %v2700_v17 }
 0x120   : > { %1903 = vmatpush2.bf16.msra.mxu1 %v2703_v18  ;;  %1863 = vmatprep.subr.bf16.mxu0 %v2708_v19 }
 0x121   : > { %1904 = vmatprep.subr.bf16.mxu1 %v2711_v20 }
 0x123   : > { %1864 = vmatpush2.bf16.msra.mxu0 %v2706_v21 }
 0x124   : > { %1905 = vmatpush2.bf16.msra.mxu1 %v2709_v22 }
 0x166   : > { %v1293_v23 = vpop.f32.mrf.mxu0 }
 0x167   : > { %v1334_v24 = vpop.f32.mrf.mxu1  ;;  %v1294_v47 = vadd.f32 %v1293_v23, %v559_v45  ;;  %v2942_v23 = vmov 1983009808  }
 0x168   : > { %v1295_v25 = vpop.f32.mrf.mxu0 }
 0x169   : > { %v1336_v26 = vpop.f32.mrf.mxu1  ;;  %v1296_v48 = vadd.f32 %v1295_v25, %v560_v46  ;;  %v1335_v49 = vadd.f32 %v1334_v24, %v1294_v47  ;;  %v1926_v24 = vunpack.c.l.s4 %v2942_v23 }
 0x16a   : > { %v1297_v27 = vpop.f32.mrf.mxu0 }
 0x16b   : > { %v1338_v28 = vpop.f32.mrf.mxu1  ;;  %v1337_v52 = vadd.f32 %v1336_v26, %v1296_v48  ;;  %v1927_v25 = vunpack.c.0.s8 %v1926_v24 }
 0x16c   : > { %v1298_v63 = vpop.f32.mrf.mxu0 }
 0x16d   : > { %v1339_v29 = vpop.f32.mrf.mxu1  ;;  %v1930_v28 = vsub.s32 %v1927_v25, %v3141_v42 }
 0x1a6   : > { %v1375_v50 = vpop.f32.mrf.mxu0 }
 0x1a7   : > { %v1416_v51 = vpop.f32.mrf.mxu1  ;;  %v1376_v53 = vadd.f32 %v1375_v50, %v1335_v49 }
 0x1a8   : > { %v1377_v54 = vpop.f32.mrf.mxu0 }
 0x1a9   : > { %v1418_v55 = vpop.f32.mrf.mxu1  ;;  %v1417_v56 = vadd.f32 %v1416_v51, %v1376_v53  ;;  %v1378_v57 = vadd.f32 %v1377_v54, %v1337_v52 }
 0x1aa   : > { %v1379_v58 = vpop.f32.mrf.mxu0 }
 0x1ab   : > { %v1420_v59 = vpop.f32.mrf.mxu1  ;;  %v1419_v60 = vadd.f32 %v1418_v55, %v1378_v57  ;;  %v1423_v61 = vmax.f32 %v1417_v56, 0.0 }
 0x1ac   : > { %v1380_v62 = vpop.f32.mrf.mxu0 }
 0x1ad   : > { %v1421_v0 = vpop.f32.mrf.mxu1  ;;  %v1424_v1 = vmax.f32 %v1419_v60, 0.0  ;;  %v1425_v3 = vpack.c.bf16 %v1423_v61, %v1423_v61 }
 0x1af   : > { %v1426_v2 = vpack.c.bf16 %v1424_v1, %v1424_v1 }
 0x1b1   : > { %1865 = vmatprep.mubr.bf16.mxu0 %v1426_v2  ;;  %1906 = vmatprep.mubr.bf16.mxu1 %v1426_v2 }
 0x1b2   : > { %1866 = vmatmul.mubr.bf16.vlgmr.msra.gmra.mxu0 %v1425_v3  ;;  %1907 = vmatmul.mubr.bf16.vlgmr.msra.gmra.mxu1 %v1425_v3 }
 0x272   : > { %v1867_v11 = vpop.f32.mrf.mxu0  ;;  %v1908_v12 = vpop.f32.mrf.mxu1 }
 0x273   : > { %v1868_v13 = vadd.f32 %v1867_v11, %v1496_v7  ;;  %v1909_v14 = vadd.f32 %v1908_v12, %v1504_v8 }
 0x274   : > { %v1869_v15 = vpop.f32.mrf.mxu0  ;;  %v1910_v16 = vpop.f32.mrf.mxu1 }
 0x275   : > { %2712 = vtanh.f32 %v1868_v13  ;;  %v1870_v17 = vadd.f32 %v1869_v15, %v1500_v9  ;;  %v1911_v18 = vadd.f32 %v1910_v16, %v1508_v10 }
 0x276   : > { %2714 = vtanh.f32 %v1909_v14  ;;  %v1871_v19 = vpop.f32.mrf.mxu0  ;;  %v1912_v20 = vpop.f32.mrf.mxu1 }
 0x277   : > { %2716 = vtanh.f32 %v1870_v17 }
 0x278   : > { %2718 = vtanh.f32 %v1911_v18  ;;  %v1872_v21 = vpop.f32.mrf.mxu0  ;;  %v1913_v22 = vpop.f32.mrf.mxu1 }
 0x282   : > { %v2713_v26 = vpop.eup %2712 }
 0x283   : > { %v2715_v27 = vpop.eup %2714 }
 0x284   : > { %v2717_v63 = vpop.eup %2716 }
 0x285   : > { %v2719_v29 = vpop.eup %2718  ;;  %v1923_v30 = vcombine.low %v2713_v26, %v2717_v63 }
 0x286   : > { %v1924_v31 = vcombine.low %v2715_v27, %v2719_v29 }
 0x287   : > { %v1931_v32 = vrot.slane %v1923_v30, %v1930_v28 }
 0x288   : > { %v1938_v33 = vrot.slane %v1924_v31, %v1930_v28 }
 0x28a   : > { %v1939_v34 = vcombine.low %v1931_v32, %v1938_v33 }
 0x28c   : > { %1941 = vst [vmem:[%s384_s21] sm:$0xff] %v1939_v34 }
 0x28d   : > { %2850 = shalt.err (!%p2847_p0)
}
 0x28e   : > { %s2851_s30 = scalar_lea.hbm %s1957_s13, 128  ;;  %s2855_s14 = scalar_lea.hbm %s3275_s7, 256 }
 0x28f   : > { %p2852_p4 = scmp.ne.s32.totalorder %s1957_s13, %s2851_s30  ;;  %p2856_p5 = scmp.lt.s32.totalorder %s1957_s13, %s3275_s7 }
 0x290   : > { %p2857_p8 = scmp.lt.s32.totalorder %s2855_s14, %s2851_s30 }
 0x291   : > { %p2853_p12 = pnand %p2852_p4, %p3092_p9 }
 0x292   : > { %p2858_p1 = por %p2857_p8, %p2856_p5 }
 0x293   : > { %p2854_p3 = pneg %p2853_p12 }
 0x295   : > { %p2859_p7 = pnand %p2858_p1, %p2854_p3 }
 0x297   : > { %2862 = shalt.err (!%p2859_p7)
}
 0x298   : > { %2331 = dma.vmem_to_hbm [thread:$0]  (%p3092_p9), %s1960_s22, 128, %s1957_s13, %s1943_s9  }
 0x299 PF: > { %s1971_s15 = sand.u32 1, %s2909_s24   ;;  %p3292_p6 = scmp.ne.s32.totalorder %s3283_s12, 0 }
 0x29a   : > { %p3293_p11 = scmp.ge.s32.totalorder %s2929_s29, 2  ;;  %s1972_s21 = scalar_lea.sflag [#allocation4], %s1971_s15 }
 0x29c   : > { %p2351_p2 = pnand %p3293_p11, %p3292_p6 }
 0x29e   : > { %p2352_p13 = pneg %p2351_p2 }
 0x2a0   : > { %2904 = dma.done.wait (%p2352_p13), %s1972_s21, 128  }
 0x2a1   : > { %2906 = vsyncadd (%p2352_p13), %s1972_s21, 4294967168  ;;  %s26_s29 = sadd.s32 1, %s2929_s29   ;;  %s3294_s24 = smov %s2913_s25 }
 0x2a2   : > { %p23_p10 = scmp.ge.s32.totalorder %s26_s29, 4   ;;  %s3295_s25 = smov %s2917_s26 }
 0x2a3   : > { %s3296_s26 = smov %s3101_s20  ;;  %s3297_s27 = smov %s2925_s28 }
 0x2a4   : > { %s3298_s28 = smov %s3300_s18  ;;  %25 = sbr.rel (!%p23_p10) target bundleno = 13 (0xd), region = 115 }
 0x2a9   :  { %1977 = vsyncpa [#allocation3], 1 }
 0x2aa   :  { %1979 = vsyncpa [#allocation3 + $0x1], 1 }
 0x2ab   :  { %1980 = vsyncpa [#allocation8], 1 }
 0x2ac   :  { %1981 = vsyncpa [#allocation11], 1 }
 0x2ad   :  { %1983 = vsyncpa [#allocation11 + $0x1], 1 }
 0x2ae   :  { %1984 = vsyncpa [#allocation4], 1 }
 0x2af   :  { %1986 = vsyncpa [#allocation4 + $0x1], 1 }
 0x2b0   :  { %1987 = vsyncpa [#allocation5], 1 }
 0x2b1   :  { %1989 = vsyncpa [#allocation5 + $0x1], 1 }

</bundles_post_ra>
